<compile_context>
chip_gen: v7x
topology: tpu7x:2x2x1
jax: 0.10.0
libtpu: 0.0.40
codegen_flags: <defaults>
</compile_context>

<pallas_src>
import jax
import jax.numpy as jnp
from jax.experimental import pallas as pl
from jax.experimental.pallas import tpu as pltpu

LN_EPS = 1e-5
D_IN = 512      # LayerNorm / first Linear input width
D_H1 = 1024     # mlp hidden
D_H2 = 500      # mlp output / fc input
D_OUT = 64      # fc output


def _head_kernel(x_ref, w_ref, b_ref, o_ref):
    # LayerNorm statistics in fp32 (gamma/beta are folded into w/b offline).
    x = x_ref[...].astype(jnp.float32)
    mu = jnp.mean(x, axis=-1, keepdims=True)
    xc = x - mu
    var = jnp.mean(xc * xc, axis=-1, keepdims=True)
    xn = xc * jax.lax.rsqrt(var + LN_EPS)
    # Collapsed affine chain: LN-affine + Linear(512,1024) + Linear(1024,500)
    # + Linear(500,64)  ==  one (512, 64) matmul + bias (exact: the original
    # module has no activations between the Linear layers).
    out = jnp.dot(xn, w_ref[...], preferred_element_type=jnp.float32) + b_ref[...]
    o_ref[...] = out.astype(o_ref.dtype)


def collapse_params(params):
    """Fold LayerNorm affine + the three activation-free Linear layers into a
    single (512, 64) weight and (1, 64) bias.  Runs once per parameter set
    (offline, not per forward call), in high precision."""
    gamma, beta, w1, b1, w2, b2, w3, b3 = params
    hp = jax.lax.Precision.HIGHEST
    w23 = jnp.dot(w2, w3, precision=hp)                      # (1024, 64)
    w123 = jnp.dot(w1, w23, precision=hp)                    # (512, 64)
    w = gamma.reshape(D_IN, 1) * w123                        # fold LN gamma
    b = (jnp.dot(beta, w123, precision=hp)                   # fold LN beta
         + jnp.dot(b1, w23, precision=hp)
         + jnp.dot(b2, w3, precision=hp)
         + b3)                                               # (1, 64)
    return w, b


def classifier_head(feats, w, b, *, block_b=128):
    """feats: [B, 512] backbone output; (w, b) from collapse_params.
    Returns [B, 64]."""
    B, D = feats.shape
    assert D == D_IN and w.shape == (D_IN, D_OUT) and b.shape == (1, D_OUT)

    # Batch tile: full batch when small (block == array dims is always legal),
    # otherwise 128 rows (multiple of 8) -> bounded VMEM + pipelined feats DMA.
    tb = B if B <= block_b else block_b
    grid = (pl.cdiv(B, tb),)

    flops = 2 * B * D_IN * D_OUT + 6 * B * D_IN
    bytes_accessed = 4 * (B * D_IN + D_IN * D_OUT + D_OUT + B * D_OUT)

    return pl.pallas_call(
        _head_kernel,
        out_shape=jax.ShapeDtypeStruct((B, D_OUT), feats.dtype),
        grid=grid,
        in_specs=[
            pl.BlockSpec((tb, D_IN), lambda i: (i, 0)),       # feats tile
            pl.BlockSpec((D_IN, D_OUT), lambda i: (0, 0)),    # collapsed W (grid-resident)
            pl.BlockSpec((1, D_OUT), lambda i: (0, 0)),       # collapsed bias (grid-resident)
        ],
        out_specs=pl.BlockSpec((tb, D_OUT), lambda i: (i, 0)),
        compiler_params=pltpu.CompilerParams(
            dimension_semantics=("parallel",)),               # v7x: shard batch over 2 TCs
        cost_estimate=pl.CostEstimate(
            flops=flops, transcendentals=B, bytes_accessed=bytes_accessed),
    )(feats, w, b)


def init_params(key):
    """Deterministic parameter init mimicking nn.Linear / nn.LayerNorm shapes."""
    k1, k2, k3, k4, k5, k6 = jax.random.split(key, 6)

    def linear(kw, kb, fan_in, fan_out):
        bound = 1.0 / jnp.sqrt(fan_in)
        wgt = jax.random.uniform(kw, (fan_in, fan_out), jnp.float32, -bound, bound)
        bias = jax.random.uniform(kb, (1, fan_out), jnp.float32, -bound, bound)
        return wgt, bias

    gamma = jnp.ones((1, D_IN), jnp.float32)
    beta = jnp.zeros((1, D_IN), jnp.float32)
    w1, b1 = linear(k1, k2, D_IN, D_H1)
    w2, b2 = linear(k3, k4, D_H1, D_H2)
    w3, b3 = linear(k5, k6, D_H2, D_OUT)
    return gamma, beta, w1, b1, w2, b2, w3, b3


def _reference(feats, params):
    """Un-collapsed fp32 reference (matches the original PyTorch head)."""
    gamma, beta, w1, b1, w2, b2, w3, b3 = params
    hp = jax.lax.Precision.HIGHEST
    x = feats.astype(jnp.float32)
    mu = x.mean(-1, keepdims=True)
    var = ((x - mu) ** 2).mean(-1, keepdims=True)
    xn = (x - mu) / jnp.sqrt(var + LN_EPS) * gamma + beta
    h1 = jnp.dot(xn, w1, precision=hp) + b1
    h2 = jnp.dot(h1, w2, precision=hp) + b2
    return jnp.dot(h2, w3, precision=hp) + b3


if __name__ == "__main__":
    key = jax.random.PRNGKey(0)
    kx, kp = jax.random.split(key)

    params = init_params(kp)
    w, b = collapse_params(params)     # offline, once per parameter set

    # Small case: synthetic backbone output (stand-in for ViTModel(x1, y, z1)).
    B = 2
    feats = jax.random.normal(kx, (B, D_IN), jnp.float32)
    out = jax.block_until_ready(classifier_head(feats, w, b))
    ref = _reference(feats, params)
    assert out.shape == (B, D_OUT)
    assert jnp.allclose(out, ref, atol=2e-3, rtol=2e-3), \
        float(jnp.max(jnp.abs(out - ref)))

    # Multi-tile case: exercises grid > 1, partial last block, resident weights.
    B2 = 200
    feats2 = jax.random.normal(jax.random.fold_in(kx, 1), (B2, D_IN), jnp.float32)
    out2 = jax.block_until_ready(classifier_head(feats2, w, b))
    ref2 = _reference(feats2, params)
    assert out2.shape == (B2, D_OUT)
    assert jnp.allclose(out2, ref2, atol=2e-3, rtol=2e-3), \
        float(jnp.max(jnp.abs(out2 - ref2)))

    print("KERNEL_OK")
</pallas_src>

<mosaic_0001>
module attributes {stable_mosaic.version = 11 : i64} {
  func.func @_head_kernel(%arg0: i32, %arg1: memref<2x512xf32, #tpu.memory_space<vmem>>, %arg2: memref<512x64xf32, #tpu.memory_space<vmem>>, %arg3: memref<1x64xf32, #tpu.memory_space<vmem>>, %arg4: memref<2x64xf32, #tpu.memory_space<vmem>>) attributes {dimension_semantics = [#tpu.dimension_semantics<parallel>], iteration_bounds = array<i64: 1>, scalar_prefetch = 0 : i64, scratch_operands = 0 : i64, tpu.core_type = #tpu.core_type<tc>, window_params = [{transform_indices = @transform_0, window_bounds = array<i64: 2, 512>}, {pipeline_mode = #tpu.pipeline_mode<synchronous>, transform_indices = @transform_1, window_bounds = array<i64: 512, 64>}, {pipeline_mode = #tpu.pipeline_mode<synchronous>, transform_indices = @transform_2, window_bounds = array<i64: 1, 64>}, {transform_indices = @transform_3, window_bounds = array<i64: 2, 64>}]} {
    %c0 = arith.constant 0 : index
    %c0_0 = arith.constant 0 : index
    %0 = vector.load %arg1[%c0, %c0_0] : memref<2x512xf32, #tpu.memory_space<vmem>>, vector<2x512xf32>
    %cst = arith.constant dense<0.000000e+00> : vector<2xf32>
    %1 = vector.multi_reduction <add>, %0, %cst [1] : vector<2x512xf32> to vector<2xf32>
    %2 = vector.shape_cast %1 : vector<2xf32> to vector<2x1xf32>
    %cst_1 = arith.constant 5.120000e+02 : f32
    %3 = vector.broadcast %cst_1 : f32 to vector<2x1xf32>
    %4 = arith.divf %2, %3 : vector<2x1xf32>
    %5 = vector.broadcast %4 : vector<2x1xf32> to vector<2x512xf32>
    %6 = arith.subf %0, %5 : vector<2x512xf32>
    %7 = arith.mulf %6, %6 : vector<2x512xf32>
    %cst_2 = arith.constant dense<0.000000e+00> : vector<2xf32>
    %8 = vector.multi_reduction <add>, %7, %cst_2 [1] : vector<2x512xf32> to vector<2xf32>
    %9 = vector.shape_cast %8 : vector<2xf32> to vector<2x1xf32>
    %cst_3 = arith.constant 5.120000e+02 : f32
    %10 = vector.broadcast %cst_3 : f32 to vector<2x1xf32>
    %11 = arith.divf %9, %10 : vector<2x1xf32>
    %cst_4 = arith.constant 9.99999974E-6 : f32
    %12 = vector.broadcast %cst_4 : f32 to vector<2x1xf32>
    %13 = arith.addf %11, %12 : vector<2x1xf32>
    %14 = math.rsqrt %13 : vector<2x1xf32>
    %15 = vector.broadcast %14 : vector<2x1xf32> to vector<2x512xf32>
    %16 = arith.mulf %6, %15 : vector<2x512xf32>
    %c0_5 = arith.constant 0 : index
    %c0_6 = arith.constant 0 : index
    %17 = vector.load %arg2[%c0_5, %c0_6] : memref<512x64xf32, #tpu.memory_space<vmem>>, vector<512x64xf32>
    %cst_7 = arith.constant dense<0.000000e+00> : vector<2x64xf32>
    %18 = tpu.matmul %16, %17, %cst_7 {dimension_numbers = #tpu.dot_dimension_numbers<[1], [0], [0], [1], [0, 0, 1, 1], [], []>} : vector<2x512xf32>, vector<512x64xf32>, vector<2x64xf32> -> vector<2x64xf32>
    %c0_8 = arith.constant 0 : index
    %c0_9 = arith.constant 0 : index
    %19 = vector.load %arg3[%c0_8, %c0_9] : memref<1x64xf32, #tpu.memory_space<vmem>>, vector<1x64xf32>
    %20 = vector.broadcast %19 : vector<1x64xf32> to vector<2x64xf32>
    %21 = arith.addf %18, %20 : vector<2x64xf32>
    %c0_10 = arith.constant 0 : index
    %c0_11 = arith.constant 0 : index
    %22 = vector.load %arg4[%c0_10, %c0_11] : memref<2x64xf32, #tpu.memory_space<vmem>>, vector<2x64xf32>
    tpu.vector_store %arg4[%c0_10, %c0_11], %21 {strides = array<i32>} : memref<2x64xf32, #tpu.memory_space<vmem>>, vector<2x64xf32>,
    return
  }
  func.func @transform_0(%arg0: i32) -> (i32, i32) {
    %c0_i32 = arith.constant 0 : i32
    %c0_i32_0 = arith.constant 0 : i32
    return %arg0, %c0_i32 : i32, i32
  }
  func.func @transform_1(%arg0: i32) -> (i32, i32) {
    %c0_i32 = arith.constant 0 : i32
    %c0_i32_0 = arith.constant 0 : i32
    %c0_i32_1 = arith.constant 0 : i32
    return %c0_i32, %c0_i32_0 : i32, i32
  }
  func.func @transform_2(%arg0: i32) -> (i32, i32) {
    %c0_i32 = arith.constant 0 : i32
    %c0_i32_0 = arith.constant 0 : i32
    %c0_i32_1 = arith.constant 0 : i32
    return %c0_i32, %c0_i32_0 : i32, i32
  }
  func.func @transform_3(%arg0: i32) -> (i32, i32) {
    %c0_i32 = arith.constant 0 : i32
    %c0_i32_0 = arith.constant 0 : i32
    return %arg0, %c0_i32 : i32, i32
  }
}

</mosaic_0001>

<bundles_post_ra>
// kernel: tpu_custom_call.1
= control target key start
LH: loop header
LB: loop body
LE: loop exit
PB: predicated region body
PF: predicated region fallthrough
CT: control target
= control target key end

     0   :  { %v21_v0 = vlaneseq  ;;  %v519_v1 = vmov 1983009808   ;;  %s777_s0 = inlined_call_operand.vmem [shape: f32[2,512], index: 0, kind: input, shape index: {}]   ;;  %s778_s1 = inlined_call_operand.vmem [shape: f32[512,64], index: 1, kind: input, shape index: {}]   ;;  %s779_s2 = inlined_call_operand.vmem [shape: f32[1,64], index: 2, kind: input, shape index: {}]   ;;  %s780_s3 = inlined_call_operand.hbm [shape: f32[2,64], index: 3, kind: output, shape index: {}]  }
   0x1   :  { %v19_v2 = vunpack.c.l.s4 %v519_v1 }
   0x2   :  { %8 = vsyncpa [#allocation3], 0  ;;  %v15_v3 = vld [vmem:[%s777_s0] sm:$0xff]  ;;  %v22_v4 = vshrl.u32 %v21_v0, 7  ;;  %vm38_vm0 = vcmask 1041408   ;;  %v122_v20 = vld [vmem:[%s778_s1 + $0x88] sm:$0xff] }
   0x3   :  { %v17_v5 = vcombine.high %v15_v3, %v15_v3  ;;  %v20_v6 = vunpack.c.0.s8 %v19_v2  ;;  %v121_v19 = vld [vmem:[%s778_s1 + $0x80] sm:$0xff]  ;;  %v106_v23 = vld [vmem:[%s778_s1 + $0x8] sm:$0xff]  ;;  %v123_v30 = vld [vmem:[%s778_s1 + $0x90] sm:$0xff]  ;;  %v520_v43 = vmov 269488144   ;;  %s521_s30 = smov [#allocation2]  }
   0x4   :  { %v105_v21 = vld [vmem:[%s778_s1] sm:$0xff]  ;;  %v425_v22 = vpack.c.bf16 %v122_v20, %v121_v19  ;;  %v154_v25 = vld [vmem:[%s778_s1 + $0x188] sm:$0xff]  ;;  %v124_v32 = vld [vmem:[%s778_s1 + $0x98] sm:$0xff]  ;;  %v52_v44 = vunpack.c.l.s4 %v520_v43  ;;  %s346_s4 = sshll.u32 %s521_s30, 4  ;;  %vm338_vm1 = vcmask 517120   ;;  %s347_s4 = int_to_ptr.vmem [resolvable:$true] %s346_s4 }
   0x5   :  { %v545_v7 = vsub.s32 %v20_v6, %v22_v4  ;;  %v153_v24 = vld [vmem:[%s778_s1 + $0x180] sm:$0xff]  ;;  %v427_v26 = vpack.c.bf16 %v106_v23, %v105_v21  ;;  %v138_v29 = vld [vmem:[%s778_s1 + $0x108] sm:$0xff]  ;;  %v107_v33 = vld [vmem:[%s778_s1 + $0x10] sm:$0xff]  ;;  %v429_v35 = vpack.c.bf16 %v124_v32, %v123_v30  ;;  %s495_s5 = scalar_lea.vmem %s347_s4, 32  ;;  %p500_p1 = scmp.lt.s32.totalorder %s347_s4, %s347_s4 }
   0x6   :  { %v457_v27 = vpack.c.bf16 %v154_v25, %v153_v24  ;;  %v137_v28 = vld [vmem:[%s778_s1 + $0x100] sm:$0xff]  ;;  %426 = vmatprep.subr.bf16.mxu0 %v425_v22  ;;  %v108_v34 = vld [vmem:[%s778_s1 + $0x18] sm:$0xff]  ;;  %v155_v37 = vld [vmem:[%s778_s1 + $0x190] sm:$0xff]  ;;  %v53_v45 = vunpack.c.0.s8 %v52_v44  ;;  %p496_p0 = scmp.ne.s32.totalorder %s347_s4, %s495_s5  ;;  %p501_p2 = scmp.lt.s32.totalorder %s495_s5, %s495_s5 }
   0x7   :  { %v24_v8 = vrot.slane %v15_v3, %v545_v7  ;;  %v31_v9 = vrot.slane %v17_v5, %v545_v7  ;;  %v459_v31 = vpack.c.bf16 %v138_v29, %v137_v28  ;;  %428 = vmatpush3.bf16.msra.mxu0 %v427_v26  ;;  %v431_v36 = vpack.c.bf16 %v108_v34, %v107_v33  ;;  %v156_v38 = vld [vmem:[%s778_s1 + $0x198] sm:$0xff]  ;;  %v139_v39 = vld [vmem:[%s778_s1 + $0x110] sm:$0xff]  ;;  %v125_v0 = vld [vmem:[%s778_s1 + $0xa0] sm:$0xff] }
   0x8   :  { %458 = vmatprep.subr.bf16.mxu1 %v457_v27  ;;  %v461_v40 = vpack.c.bf16 %v156_v38, %v155_v37  ;;  %v140_v41 = vld [vmem:[%s778_s1 + $0x118] sm:$0xff]  ;;  %430 = vmatprep.subr.bf16.mxu0 %v429_v35  ;;  %v601_v46 = vsub.s32 %v53_v45, %v22_v4  ;;  %v126_v1 = vld [vmem:[%s778_s1 + $0xa8] sm:$0xff]  ;;  %v157_v6 = vld [vmem:[%s778_s1 + $0x1a0] sm:$0xff]  ;;  %p502_p3 = por %p501_p2, %p500_p1 }
   0x9   :  { %v32_v10 = vcombine.high %v24_v8, %v24_v8  ;;  %v33_v11 = vcombine.high %v31_v9, %v31_v9  ;;  %v39_v12 = vsel %vm38_vm0, %v24_v8, 0.0  ;;  %v42_v14 = vsel %vm38_vm0, %v31_v9, 0.0  ;;  %460 = vmatpush3.bf16.msra.mxu1 %v459_v31  ;;  %v110_v4 = vld [vmem:[%s778_s1 + $0x28] sm:$0xff]  ;;  %v159_v19 = vld [vmem:[%s778_s1 + $0x1b0] sm:$0xff]  ;;  %v160_v20 = vld [vmem:[%s778_s1 + $0x1b8] sm:$0xff] }
   0xa   :  { %v463_v42 = vpack.c.bf16 %v140_v41, %v139_v39  ;;  %462 = vmatprep.subr.bf16.mxu1 %v461_v40  ;;  %v433_v2 = vpack.c.bf16 %v126_v1, %v125_v0  ;;  %v158_v8 = vld [vmem:[%s778_s1 + $0x1a8] sm:$0xff]  ;;  %v469_v21 = vpack.c.bf16 %v160_v20, %v159_v19  ;;  %v143_v22 = vld [vmem:[%s778_s1 + $0x130] sm:$0xff]  ;;  %v144_v23 = vld [vmem:[%s778_s1 + $0x138] sm:$0xff]  ;;  %p503_p4 = pnand %p502_p3, %p496_p0 }
   0xb   :  { %v40_v13 = vsel %vm38_vm0, %v32_v10, 0.0  ;;  %v44_v16 = vsel %vm38_vm0, %v33_v11, 0.0  ;;  %432 = vmatpush3.bf16.msra.mxu0 %v431_v36  ;;  %v465_v9 = vpack.c.bf16 %v158_v8, %v157_v6  ;;  %v141_v10 = vld [vmem:[%s778_s1 + $0x120] sm:$0xff]  ;;  %v142_v11 = vld [vmem:[%s778_s1 + $0x128] sm:$0xff]  ;;  %v471_v25 = vpack.c.bf16 %v144_v23, %v143_v22  ;;  %v131_v36 = vld [vmem:[%s778_s1 + $0xd0] sm:$0xff] }
   0xc   :  { %v41_v15 = vadd.f32 %v40_v13, %v39_v12  ;;  %434 = vmatprep.subr.bf16.mxu0 %v433_v2  ;;  %v467_v12 = vpack.c.bf16 %v142_v11, %v141_v10  ;;  %v127_v13 = vld [vmem:[%s778_s1 + $0xb0] sm:$0xff]  ;;  %v129_v24 = vld [vmem:[%s778_s1 + $0xc0] sm:$0xff]  ;;  %v130_v26 = vld [vmem:[%s778_s1 + $0xc8] sm:$0xff] }
   0xd   :  { %464 = vmatpush3.bf16.msra.mxu1 %v463_v42  ;;  %v113_v27 = vld [vmem:[%s778_s1 + $0x40] sm:$0xff]  ;;  %v114_v28 = vld [vmem:[%s778_s1 + $0x48] sm:$0xff]  ;;  %v441_v29 = vpack.c.bf16 %v130_v26, %v129_v24  ;;  %v132_v37 = vld [vmem:[%s778_s1 + $0xd8] sm:$0xff] }
   0xe   :  { %v43_v17 = vadd.f32 %v42_v14, %v41_v15  ;;  %v128_v14 = vld [vmem:[%s778_s1 + $0xb8] sm:$0xff]  ;;  %466 = vmatprep.subr.bf16.mxu1 %v465_v9  ;;  %v443_v30 = vpack.c.bf16 %v114_v28, %v113_v27  ;;  %v161_v31 = vld [vmem:[%s778_s1 + $0x1c0] sm:$0xff]  ;;  %v162_v32 = vld [vmem:[%s778_s1 + $0x1c8] sm:$0xff]  ;;  %v445_v39 = vpack.c.bf16 %v132_v37, %v131_v36 }
   0xf   :  { %v437_v15 = vpack.c.bf16 %v128_v14, %v127_v13  ;;  %v145_v33 = vld [vmem:[%s778_s1 + $0x140] sm:$0xff]  ;;  %v473_v34 = vpack.c.bf16 %v162_v32, %v161_v31  ;;  %v146_v35 = vld [vmem:[%s778_s1 + $0x148] sm:$0xff]  ;;  %v115_v40 = vld [vmem:[%s778_s1 + $0x50] sm:$0xff] }
  0x10   :  { %v45_v18 = vadd.f32 %v44_v16, %v43_v17  ;;  %v111_v16 = vld [vmem:[%s778_s1 + $0x30] sm:$0xff]  ;;  %v112_v17 = vld [vmem:[%s778_s1 + $0x38] sm:$0xff]  ;;  %v475_v38 = vpack.c.bf16 %v146_v35, %v145_v33  ;;  %v354_v24 = vld [vmem:[%s779_s2] ss:$0 sm:$0xff] }
  0x11   :  { %468 = vmatpush3.bf16.msra.mxu1 %v467_v12  ;;  %v116_v41 = vld [vmem:[%s778_s1 + $0x58] sm:$0xff]  ;;  %v163_v42 = vld [vmem:[%s778_s1 + $0x1d0] sm:$0xff] }
  0x12   :  { %46 = vadd.xlane.f32.xlu0 %v45_v18  ;;  %v439_v18 = vpack.c.bf16 %v112_v17, %v111_v16  ;;  %470 = vmatprep.subr.bf16.mxu1 %v469_v21  ;;  %v447_v43 = vpack.c.bf16 %v116_v41, %v115_v40  ;;  %v164_v44 = vld [vmem:[%s778_s1 + $0x1d8] sm:$0xff]  ;;  %v147_v45 = vld [vmem:[%s778_s1 + $0x150] sm:$0xff] }
  0x13   :  { %v119_v0 = vld [vmem:[%s778_s1 + $0x70] sm:$0xff]  ;;  %v120_v2 = vld [vmem:[%s778_s1 + $0x78] sm:$0xff] }
  0x14   :  { %v455_v8 = vpack.c.bf16 %v120_v2, %v119_v0  ;;  %v151_v9 = vld [vmem:[%s778_s1 + $0x170] sm:$0xff]  ;;  %v152_v10 = vld [vmem:[%s778_s1 + $0x178] sm:$0xff] }
  0x15   :  { %472 = vmatpush3.bf16.msra.mxu1 %v471_v25  ;;  %v487_v11 = vpack.c.bf16 %v152_v10, %v151_v9 }
  0x16   :  { %474 = vmatprep.subr.bf16.mxu1 %v473_v34 }
  0x19   :  { %476 = vmatpush3.bf16.msra.mxu1 %v475_v38 }
  0x9f   :  { %v47_v47 = vpop.xlane.xlu0 %46 }
  0xa0   :  { %v49_v48 = vmul.f32 0.001953125, %v47_v47  ;;  %v148_v47 = vld [vmem:[%s778_s1 + $0x158] sm:$0xff] }
  0xa2   :  { %v57_v49 = vrot.slane %v49_v48, %v601_v46  ;;  %v477_v48 = vpack.c.bf16 %v164_v44, %v163_v42 }
  0xa4   :  { %v604_v50 = vsub.f32 %v15_v3, %v57_v49  ;;  %v109_v3 = vld [vmem:[%s778_s1 + $0x20] sm:$0xff]  ;;  %478 = vmatprep.subr.bf16.mxu1 %v477_v48 }
  0xa5   :  { %v435_v5 = vpack.c.bf16 %v110_v4, %v109_v3  ;;  %v133_v49 = vld [vmem:[%s778_s1 + $0xe0] sm:$0xff]  ;;  %v167_v3 = vld [vmem:[%s778_s1 + $0x1f0] sm:$0xff]  ;;  %v168_v4 = vld [vmem:[%s778_s1 + $0x1f8] sm:$0xff] }
  0xa6   :  { %v60_v51 = vmul.f32 %v604_v50, %v604_v50  ;;  %v485_v6 = vpack.c.bf16 %v168_v4, %v167_v3 }
  0xa7   :  { %436 = vmatpush3.bf16.msra.mxu0 %v435_v5 }
  0xa8   :  { %v62_v52 = vcombine.high %v60_v51, %v60_v51  ;;  %v69_v53 = vrot.slane %v60_v51, %v545_v7  ;;  %438 = vmatprep.subr.bf16.mxu0 %v437_v15  ;;  %v134_v51 = vld [vmem:[%s778_s1 + $0xe8] sm:$0xff] }
  0xaa   :  { %v76_v54 = vrot.slane %v62_v52, %v545_v7  ;;  %v77_v55 = vcombine.high %v69_v53, %v69_v53  ;;  %v83_v57 = vsel %vm38_vm0, %v69_v53, 0.0  ;;  %v117_v52 = vld [vmem:[%s778_s1 + $0x60] sm:$0xff]  ;;  %v479_v53 = vpack.c.bf16 %v148_v47, %v147_v45 }
  0xab   :  { %440 = vmatpush3.bf16.msra.mxu0 %v439_v18 }
  0xac   :  { %v78_v56 = vcombine.high %v76_v54, %v76_v54  ;;  %v84_v58 = vsel %vm38_vm0, %v77_v55, 0.0  ;;  %v86_v60 = vsel %vm38_vm0, %v76_v54, 0.0  ;;  %442 = vmatprep.subr.bf16.mxu0 %v441_v29  ;;  %v449_v54 = vpack.c.bf16 %v134_v51, %v133_v49  ;;  %v118_v55 = vld [vmem:[%s778_s1 + $0x68] sm:$0xff]  ;;  %480 = vmatpush3.bf16.msra.mxu1 %v479_v53 }
  0xad   :  { %v85_v59 = vadd.f32 %v84_v58, %v83_v57  ;;  %v166_v57 = vld [vmem:[%s778_s1 + $0x1e8] sm:$0xff] }
  0xae   :  { %v88_v62 = vsel %vm38_vm0, %v78_v56, 0.0  ;;  %v165_v56 = vld [vmem:[%s778_s1 + $0x1e0] sm:$0xff] }
  0xaf   :  { %v87_v61 = vadd.f32 %v86_v60, %v85_v59  ;;  %444 = vmatpush3.bf16.msra.mxu0 %v443_v30  ;;  %v481_v58 = vpack.c.bf16 %v166_v57, %v165_v56  ;;  %v149_v59 = vld [vmem:[%s778_s1 + $0x160] sm:$0xff]  ;;  %v150_v60 = vld [vmem:[%s778_s1 + $0x168] sm:$0xff] }
  0xb0   :  { %446 = vmatprep.subr.bf16.mxu0 %v445_v39  ;;  %v483_v5 = vpack.c.bf16 %v150_v60, %v149_v59 }
  0xb1   :  { %v89_v63 = vadd.f32 %v88_v62, %v87_v61  ;;  %v135_v61 = vld [vmem:[%s778_s1 + $0xf0] sm:$0xff]  ;;  %v451_v62 = vpack.c.bf16 %v118_v55, %v117_v52  ;;  %482 = vmatprep.subr.bf16.mxu1 %v481_v58 }
  0xb2   :  { %484 = vmatpush3.bf16.msra.mxu1 %v483_v5 }
  0xb3   :  { %90 = vadd.xlane.f32.xlu0 %v89_v63  ;;  %448 = vmatpush3.bf16.msra.mxu0 %v447_v43  ;;  %v136_v63 = vld [vmem:[%s778_s1 + $0xf8] sm:$0xff] }
  0xb4   :  { %450 = vmatprep.subr.bf16.mxu0 %v449_v54  ;;  %v453_v1 = vpack.c.bf16 %v136_v63, %v135_v61  ;;  %486 = vmatprep.subr.bf16.mxu1 %v485_v6 }
  0xb6   :  { %488 = vmatpush3.bf16.msra.mxu1 %v487_v11 }
  0xb7   :  { %452 = vmatpush3.bf16.msra.mxu0 %v451_v62 }
  0xb8   :  { %454 = vmatprep.subr.bf16.mxu0 %v453_v1 }
  0xbb   :  { %456 = vmatpush3.bf16.msra.mxu0 %v455_v8 }
 0x140   :  { %v91_v12 = vpop.xlane.xlu0 %90 }
 0x141   :  { %v92_v13 = vmul.f32 0.001953125, %v91_v12 }
 0x143   :  { %v93_v14 = vadd.f32 1e-05, %v92_v13 }
 0x145   :  { %493 = vrsqrt.f32 %v93_v14 }
 0x14f   :  { %v494_v15 = vpop.eup %493 }
 0x150   :  { %v102_v16 = vrot.slane %v494_v15, %v601_v46 }
 0x152   :  { %v104_v17 = vmul.f32 %v102_v16, %v604_v50 }
 0x154   :  { %v184_v18 = vrot.slane %v104_v17, %v545_v7  ;;  %v177_v19 = vcombine.high %v104_v17, %v104_v17 }
 0x156   :  { %v192_v20 = vcombine.high %v184_v18, %v184_v18  ;;  %v191_v21 = vrot.slane %v177_v19, %v545_v7 }
 0x158   :  { %262 = vmatprep.mubr.f32.mxu0 %v192_v20  ;;  %v193_v22 = vcombine.high %v191_v21, %v191_v21 }
 0x159   :  { %263 = vmatmul.mubr.f32.vlgmr.msra.gmra.mrb[0].mxu0 %v184_v18 }
 0x15a   :  { %332 = vmatprep.mubr.f32.mxu1 %v193_v22 }
 0x15b   :  { %333 = vmatmul.mubr.f32.vlgmr.msra.gmra.mrb[0].mxu1 %v191_v21 }
 0x22c   :  { %v387_v23 = vpop.f32.mrb[0].mxu0 }
 0x22d   :  { %v388_v25 = vpop.f32.mrb[1].mxu0 }
 0x22e   :  { %v389_v46 = vadd.f32 %v388_v25, %v387_v23  ;;  %v422_v26 = vpop.f32.mrb[0].mxu1 }
 0x22f   :  { %v423_v50 = vpop.f32.mrb[1].mxu1 }
 0x230   :  { %v265_v27 = vadd.f32 %v389_v46, %v354_v24  ;;  %v424_v28 = vadd.f32 %v423_v50, %v422_v26 }
 0x232   :  { %v335_v7 = vadd.f32 %v424_v28, %v265_v27 }
 0x234   :  { %339 = vst.msk [vmem:[#allocation2] sm:$0x3] %vm338_vm1, %v335_v7 }
 0x235   :  { %506 = shalt.err (!%p503_p4)
}
 0x236   :  { %s507_s7 = scalar_lea.hbm %s780_s3, 32 }
 0x237   :  { %p508_p5 = scmp.ne.s32.totalorder %s780_s3, %s507_s7  ;;  %p511_p6 = scmp.lt.u32.totalorder %s507_s7, %s780_s3 }
 0x239   :  { %p513_p7 = pnand %p511_p6, %p508_p5 }
 0x23b   :  { %516 = shalt.err (!%p513_p7)
}
 0x23c   :  { %349 = dma.vmem_to_hbm [thread:$0]  %s347_s4, 32, %s780_s3, [#allocation3]  }
 0x23d   :  { %517 = dma.done.wait [#allocation3], 32  }
 0x23e   :  { %518 = vsyncadd [#allocation3], 4294967264 }
 0x23f   :  { %353 = vsyncpa [#allocation3], 1 }

</bundles_post_ra>
